<compile_context>
chip_gen: v7x
topology: tpu7x:2x2x1
jax: 0.10.0
libtpu: 0.0.40
codegen_flags: <defaults>
</compile_context>

<pallas_src>
import jax
import jax.numpy as jnp
from jax.experimental import pallas as pl
from jax.experimental.pallas import tpu as pltpu


def _round_up(a, m):
    return (a + m - 1) // m * m


def _lora_hook_kernel(x_ref, w_ref, b_ref, down_ref, up_ref, o_ref, h_ref):
    # x_ref:    (TM, H_in)   input row tile (block index constant in j -> resident)
    # w_ref:    (H_in, TN)   original Linear weight column block (W^T)
    # b_ref:    (1, TN)      original Linear bias column block
    # down_ref: (H_in, NR)   all LoRA down-projections, concatenated (resident)
    # up_ref:   (NR, TN)     all LoRA up-projections, scales folded in
    # o_ref:    (TM, TN)     output tile
    # h_ref:    (TM, NR)     scratch: x @ down_cat, computed once per row tile
    x = x_ref[...]

    # The low-rank projection only depends on the row tile i; compute it at the
    # first column tile and reuse it for all j (saves one NR-wide MXU pass per
    # remaining column tile).
    @pl.when(pl.program_id(1) == 0)
    def _():
        h_ref[...] = jnp.dot(
            x, down_ref[...], preferred_element_type=jnp.float32
        ).astype(h_ref.dtype)

    # original Linear: x @ W^T + b   (f32 accumulation on the MXU)
    y = jnp.dot(x, w_ref[...], preferred_element_type=jnp.float32)
    y = y + b_ref[...].astype(jnp.float32)

    # all LoRA adapters in one matmul against the cached low-rank activation
    y = y + jnp.dot(h_ref[...], up_ref[...], preferred_element_type=jnp.float32)

    o_ref[...] = y.astype(o_ref.dtype)


def prepare_lora_hook_weights(w, b, down, up, scales, *, tn=256):
    """One-time (weight-load-time) preparation of LoRAHook weights.

    w: [H_out, H_in]; b: [H_out]; down: [N, R, H_in]; up: [N, H_out, R];
    scales: [N] (alpha / rank per LoRA).  Returns the tuple consumed by
    lora_hook_forward.  Call this once per weight set, NOT per forward.
    """
    H_out, H_in = w.shape

    if down.shape[0] == 0:
        # no adapters installed -> LoRA contribution is exactly zero
        down = jnp.zeros((1, 8, H_in), dtype=w.dtype)
        up = jnp.zeros((1, H_out, 8), dtype=w.dtype)
        scales = jnp.zeros((1,), dtype=jnp.float32)

    N, R, _ = down.shape
    NR = N * R
    H_out_p = _round_up(H_out, tn)          # lane-dense, full-width column tiles

    w_t = jnp.pad(jnp.transpose(w, (1, 0)), ((0, 0), (0, H_out_p - H_out)))
    b2 = jnp.pad(b.reshape(1, H_out), ((0, 0), (0, H_out_p - H_out)))
    down_cat = jnp.transpose(down, (2, 0, 1)).reshape(H_in, NR)
    # Fold per-adapter scale into the up-projection (in f32).
    # NOTE: this quantizes the *scaled* weights for fp16/bf16 adapters; within
    # LoRA tolerance, but rounds differently than scaling the f32 result.
    up_cat = (scales[:, None, None].astype(jnp.float32)
              * jnp.transpose(up, (0, 2, 1)).astype(jnp.float32))
    up_cat = up_cat.reshape(NR, H_out).astype(up.dtype)
    up_cat = jnp.pad(up_cat, ((0, 0), (0, H_out_p - H_out)))

    return (w_t, b2, down_cat, up_cat, H_out, tn)


def lora_hook_forward(x, prepared, *, tm=512, vmem_budget_bytes=40 << 20):
    """LoRAHook.forward: y = x @ W^T + b + sum_i scale_i * (x @ down_i^T) @ up_i^T.

    x: [B, S, H_in].  `prepared` comes from prepare_lora_hook_weights().
    """
    w_t, b2, down_cat, up_cat, H_out, tn = prepared
    B, S, H_in = x.shape
    M = B * S
    NR = down_cat.shape[1]
    H_out_p = w_t.shape[1]
    tn_eff = tn
    itemsize = jnp.dtype(x.dtype).itemsize

    # ---- row-tile size: as large as the VMEM budget allows -------------------
    # W^T / up_cat are re-streamed once per row tile, so bigger tm directly cuts
    # the dominant HBM traffic. Budget (40 MiB) is safe on v7x's 64 MiB VMEM;
    # NOTE: the intermediate h (tm, NR) scratch is the x-dtype cast of the f32
    # down matmul (same as casting h before the up matmul).
    def vmem_need(tm_):
        blk = (tm_ * H_in          # x tile
               + H_in * tn_eff     # W^T column block
               + tn_eff            # bias block
               + H_in * NR         # down_cat (constant index -> resident)
               + NR * tn_eff       # up_cat column block
               + tm_ * tn_eff)     # output tile
        return 2 * blk * itemsize + tm_ * NR * itemsize  # 2x buffers + h scratch

    tm_eff = max(16, min(tm, _round_up(M, 16)))   # multiple of 16: bf16-safe
    while tm_eff > 16 and vmem_need(tm_eff) > vmem_budget_bytes:
        tm_eff = max(16, _round_up(tm_eff // 2, 16))

    gi = -(-M // tm_eff)                 # ragged row edge handled by Pallas
    gj = H_out_p // tn_eff
    vmem_limit = int(min(max(vmem_need(tm_eff) + (4 << 20), 16 << 20), 96 << 20))

    cost = pl.CostEstimate(
        flops=2 * M * H_in * (H_out_p + NR) + 2 * M * NR * H_out_p,
        transcendentals=0,
        bytes_accessed=int(itemsize * (
            M * H_in                     # x (resident across j)
            + gi * H_in * H_out_p        # W^T re-streamed once per row tile
            + gi * H_out_p               # bias
            + H_in * NR                  # down_cat fetched once
            + gi * NR * H_out_p          # up_cat re-streamed once per row tile
            + M * H_out_p)),             # output
    )

    x2 = x.reshape(M, H_in)

    # TODO(synk): for very large H_in (>= ~8K) add an "arbitrary" K grid axis
    # over H_in with an f32 VMEM accumulator (pl.when init/finalize) so the
    # x / W^T blocks stay bounded on v7x's 64 MiB VMEM.
    # TODO(synk): down_cat's block index is constant; pipeline_mode=pl.Buffered(1)
    # would halve its VMEM footprint (left off to keep lowering conservative).
    out = pl.pallas_call(
        _lora_hook_kernel,
        out_shape=jax.ShapeDtypeStruct((M, H_out), x.dtype),
        grid=(gi, gj),
        in_specs=[
            pl.BlockSpec((tm_eff, H_in), lambda i, j: (i, 0)),    # x row tile
            pl.BlockSpec((H_in, tn_eff), lambda i, j: (0, j)),    # W^T columns
            pl.BlockSpec((1, tn_eff), lambda i, j: (0, j)),       # bias columns
            pl.BlockSpec((H_in, NR), lambda i, j: (0, 0)),        # down_cat
            pl.BlockSpec((NR, tn_eff), lambda i, j: (0, j)),      # up_cat cols
        ],
        out_specs=pl.BlockSpec((tm_eff, tn_eff), lambda i, j: (i, j)),
        scratch_shapes=[pltpu.VMEM((tm_eff, NR), x.dtype)],
        compiler_params=pltpu.CompilerParams(
            dimension_semantics=("parallel", "arbitrary"),
            vmem_limit_bytes=vmem_limit),
        cost_estimate=cost,
    )(x2, w_t, b2, down_cat, up_cat)

    return out.reshape(B, S, H_out)


def lora_hook_reference(x, w, b, down, up, scales):
    y = jnp.einsum("bsh,oh->bso", x, w) + b
    for i in range(down.shape[0]):
        h = jnp.einsum("bsh,rh->bsr", x, down[i])
        y = y + scales[i] * jnp.einsum("bsr,or->bso", h, up[i])
    return y


if __name__ == "__main__":
    key = jax.random.PRNGKey(0)
    B, S, H_in, H_out, R, N = 2, 8, 32, 32, 4, 2

    k = jax.random.split(key, 6)
    x = jax.random.normal(k[0], (B, S, H_in), dtype=jnp.float32)
    w = jax.random.normal(k[1], (H_out, H_in), dtype=jnp.float32) * 0.1
    b = jax.random.normal(k[2], (H_out,), dtype=jnp.float32) * 0.1
    down = jax.random.normal(k[3], (N, R, H_in), dtype=jnp.float32) * 0.1
    up = jax.random.normal(k[4], (N, H_out, R), dtype=jnp.float32) * 0.1
    scales = jnp.array([1.0, 0.5], dtype=jnp.float32)   # alpha / rank per LoRA

    prepared = prepare_lora_hook_weights(w, b, down, up, scales)  # once, at load
    out = lora_hook_forward(x, prepared)
    jax.block_until_ready(out)

    ref = lora_hook_reference(x, w, b, down, up, scales)
    assert out.shape == ref.shape, (out.shape, ref.shape)
    assert jnp.allclose(out, ref, atol=1e-4, rtol=1e-4), "mismatch vs reference"

    print("KERNEL_OK")
</pallas_src>

<mosaic_0001>
module attributes {stable_mosaic.version = 11 : i64} {
  func.func @_lora_hook_kernel(%arg0: i32, %arg1: i32, %arg2: memref<16x32xf32, #tpu.memory_space<vmem>>, %arg3: memref<32x256xf32, #tpu.memory_space<vmem>>, %arg4: memref<1x256xf32, #tpu.memory_space<vmem>>, %arg5: memref<32x8xf32, #tpu.memory_space<vmem>>, %arg6: memref<8x256xf32, #tpu.memory_space<vmem>>, %arg7: memref<16x256xf32, #tpu.memory_space<vmem>>, %arg8: memref<16x8xf32, #tpu.memory_space<vmem>>) attributes {dimension_semantics = [#tpu.dimension_semantics<parallel>, #tpu.dimension_semantics<arbitrary>], iteration_bounds = array<i64: 1, 1>, scalar_prefetch = 0 : i64, scratch_operands = 1 : i64, tpu.core_type = #tpu.core_type<tc>, window_params = [{transform_indices = @transform_0, window_bounds = array<i64: 16, 32>}, {transform_indices = @transform_1, window_bounds = array<i64: 32, 256>}, {transform_indices = @transform_2, window_bounds = array<i64: 1, 256>}, {pipeline_mode = #tpu.pipeline_mode<synchronous>, transform_indices = @transform_3, window_bounds = array<i64: 32, 8>}, {transform_indices = @transform_4, window_bounds = array<i64: 8, 256>}, {transform_indices = @transform_5, window_bounds = array<i64: 16, 256>}]} {
    %c0 = arith.constant 0 : index
    %c0_0 = arith.constant 0 : index
    %0 = vector.load %arg2[%c0, %c0_0] : memref<16x32xf32, #tpu.memory_space<vmem>>, vector<16x32xf32>
    %c0_i32 = arith.constant 0 : i32
    %1 = arith.cmpi eq, %arg1, %c0_i32 : i32
    %2 = arith.extui %1 : i1 to i32
    %c0_i32_1 = arith.constant 0 : i32
    %3 = arith.cmpi ne, %2, %c0_i32_1 : i32
    scf.if %3 {
      %c0_13 = arith.constant 0 : index
      %c0_14 = arith.constant 0 : index
      %14 = vector.load %arg5[%c0_13, %c0_14] : memref<32x8xf32, #tpu.memory_space<vmem>>, vector<32x8xf32>
      %cst_15 = arith.constant dense<0.000000e+00> : vector<16x8xf32>
      %15 = tpu.matmul %0, %14, %cst_15 {dimension_numbers = #tpu.dot_dimension_numbers<[1], [0], [0], [1], [0, 0, 1, 1], [], []>} : vector<16x32xf32>, vector<32x8xf32>, vector<16x8xf32> -> vector<16x8xf32>
      %c0_16 = arith.constant 0 : index
      %c0_17 = arith.constant 0 : index
      %16 = vector.load %arg8[%c0_16, %c0_17] : memref<16x8xf32, #tpu.memory_space<vmem>>, vector<16x8xf32>
      tpu.vector_store %arg8[%c0_16, %c0_17], %15 {strides = array<i32>} : memref<16x8xf32, #tpu.memory_space<vmem>>, vector<16x8xf32>,
    } else {
    }
    %c0_2 = arith.constant 0 : index
    %c0_3 = arith.constant 0 : index
    %4 = vector.load %arg3[%c0_2, %c0_3] : memref<32x256xf32, #tpu.memory_space<vmem>>, vector<32x256xf32>
    %cst = arith.constant dense<0.000000e+00> : vector<16x256xf32>
    %5 = tpu.matmul %0, %4, %cst {dimension_numbers = #tpu.dot_dimension_numbers<[1], [0], [0], [1], [0, 0, 1, 1], [], []>} : vector<16x32xf32>, vector<32x256xf32>, vector<16x256xf32> -> vector<16x256xf32>
    %c0_4 = arith.constant 0 : index
    %c0_5 = arith.constant 0 : index
    %6 = vector.load %arg4[%c0_4, %c0_5] : memref<1x256xf32, #tpu.memory_space<vmem>>, vector<1x256xf32>
    %7 = vector.broadcast %6 : vector<1x256xf32> to vector<16x256xf32>
    %8 = arith.addf %5, %7 : vector<16x256xf32>
    %c0_6 = arith.constant 0 : index
    %c0_7 = arith.constant 0 : index
    %9 = vector.load %arg8[%c0_6, %c0_7] : memref<16x8xf32, #tpu.memory_space<vmem>>, vector<16x8xf32>
    %c0_8 = arith.constant 0 : index
    %c0_9 = arith.constant 0 : index
    %10 = vector.load %arg6[%c0_8, %c0_9] : memref<8x256xf32, #tpu.memory_space<vmem>>, vector<8x256xf32>
    %cst_10 = arith.constant dense<0.000000e+00> : vector<16x256xf32>
    %11 = tpu.matmul %9, %10, %cst_10 {dimension_numbers = #tpu.dot_dimension_numbers<[1], [0], [0], [1], [0, 0, 1, 1], [], []>} : vector<16x8xf32>, vector<8x256xf32>, vector<16x256xf32> -> vector<16x256xf32>
    %12 = arith.addf %8, %11 : vector<16x256xf32>
    %c0_11 = arith.constant 0 : index
    %c0_12 = arith.constant 0 : index
    %13 = vector.load %arg7[%c0_11, %c0_12] : memref<16x256xf32, #tpu.memory_space<vmem>>, vector<16x256xf32>
    tpu.vector_store %arg7[%c0_11, %c0_12], %12 {strides = array<i32>} : memref<16x256xf32, #tpu.memory_space<vmem>>, vector<16x256xf32>,
    return
  }
  func.func @transform_0(%arg0: i32, %arg1: i32) -> (i32, i32) {
    %c0_i32 = arith.constant 0 : i32
    %c0_i32_0 = arith.constant 0 : i32
    return %arg0, %c0_i32 : i32, i32
  }
  func.func @transform_1(%arg0: i32, %arg1: i32) -> (i32, i32) {
    %c0_i32 = arith.constant 0 : i32
    %c0_i32_0 = arith.constant 0 : i32
    return %c0_i32, %arg1 : i32, i32
  }
  func.func @transform_2(%arg0: i32, %arg1: i32) -> (i32, i32) {
    %c0_i32 = arith.constant 0 : i32
    %c0_i32_0 = arith.constant 0 : i32
    return %c0_i32, %arg1 : i32, i32
  }
  func.func @transform_3(%arg0: i32, %arg1: i32) -> (i32, i32) {
    %c0_i32 = arith.constant 0 : i32
    %c0_i32_0 = arith.constant 0 : i32
    %c0_i32_1 = arith.constant 0 : i32
    return %c0_i32, %c0_i32_0 : i32, i32
  }
  func.func @transform_4(%arg0: i32, %arg1: i32) -> (i32, i32) {
    %c0_i32 = arith.constant 0 : i32
    %c0_i32_0 = arith.constant 0 : i32
    return %c0_i32, %arg1 : i32, i32
  }
  func.func @transform_5(%arg0: i32, %arg1: i32) -> (i32, i32) {
    %c0_i32 = arith.constant 0 : i32
    return %arg0, %arg1 : i32, i32
  }
}

</mosaic_0001>

<bundles_post_ra>
// kernel: tpu_custom_call.1
= control target key start
LH: loop header
LB: loop body
LE: loop exit
PB: predicated region body
PF: predicated region fallthrough
CT: control target
= control target key end

     0   :  { %10 = vsyncpa [#allocation4], 0  ;;  %s548_s0 = inlined_call_operand.vmem [shape: f32[16,32], index: 0, kind: input, shape index: {}]   ;;  %s549_s1 = inlined_call_operand.hbm [shape: f32[32,256], index: 1, kind: input, shape index: {}]   ;;  %s550_s2 = inlined_call_operand.vmem [shape: f32[1,256], index: 2, kind: input, shape index: {}]   ;;  %s551_s3 = inlined_call_operand.vmem [shape: f32[32,8], index: 3, kind: input, shape index: {}]   ;;  %s552_s4 = inlined_call_operand.vmem [shape: f32[8,256], index: 4, kind: input, shape index: {}]   ;;  %s553_s5 = inlined_call_operand.hbm [shape: f32[16,32], index: 5, kind: output, shape index: {}]  }
   0x1   :  { %11 = vsyncpa [#allocation5], 0  ;;  %s453_s18 = smov [#allocation3]   ;;  %s405_s22 = scalar_lea.hbm %s549_s1, 1024 }
   0x2   :  { %s19_s19 = sshll.u32 %s453_s18, 4  ;;  %p406_p0 = scmp.ne.s32.totalorder %s549_s1, %s405_s22  ;;  %s20_s19 = int_to_ptr.vmem [resolvable:$true] %s19_s19 }
   0x3   :  { %p409_p1 = scmp.lt.u32.totalorder %s405_s22, %s549_s1 }
   0x5   :  { %p411_p2 = pnand %p409_p1, %p406_p0 }
   0x7   :  { %414 = shalt.err (!%p411_p2)
}
   0x8   :  { %s415_s27 = scalar_lea.vmem %s20_s19, 1024  ;;  %p420_p4 = scmp.lt.s32.totalorder %s20_s19, %s20_s19 }
   0x9   :  { %p416_p3 = scmp.ne.s32.totalorder %s20_s19, %s415_s27  ;;  %p421_p5 = scmp.lt.s32.totalorder %s415_s27, %s415_s27 }
   0xb   :  { %p422_p6 = por %p421_p5, %p420_p4 }
   0xd   :  { %p423_p7 = pnand %p422_p6, %p416_p3 }
   0xf   :  { %426 = shalt.err (!%p423_p7)
}
  0x10   :  { %s454_s28 = smov 256   ;;  %s455_s29 = smov 16  }
  0x11   :  { %25 = dma.hbm_to_vmem [thread:$0]  %s549_s1, 1024, %s20_s19, [#allocation4], %s454_s28, %s454_s28, %s455_s29  }
  0x12   :  { %449 = dma.done.wait [#allocation4], 1024  }
  0x13   :  { %450 = vsyncadd [#allocation4], 4294966272  ;;  %vm45_vm0 = vcmask 261120   ;;  %v41_v0 = vld [vmem:[%s551_s3] sm:$0xff]  ;;  %v42_v1 = vld [vmem:[%s551_s3 + $0x8] sm:$0xff]  ;;  %v456_v21 = vmov 0.0   ;;  %v140_v29 = vlaneseq }
  0x14   :  { %v43_v2 = vld [vmem:[%s551_s3 + $0x10] sm:$0xff]  ;;  %v370_v3 = vpack.c.bf16 %v42_v1, %v41_v0  ;;  %v44_v4 = vld [vmem:[%s551_s3 + $0x18] sm:$0xff]  ;;  %v35_v5 = vld [vmem:[%s548_s0] sm:$0xff]  ;;  %227 = vmatprep.mubr.f32.mxu1 %v456_v21  ;;  %vm127_vm1 = vcmask 64512  }
  0x15   :  { %v374_v6 = vpack.c.bf16 %v44_v4, %v43_v2  ;;  %367 = vmatprep.mubr.msk.f32.mxu0 %vm45_vm0, %v35_v5  ;;  %v131_v7 = vld [vmem:[#allocation3 + $0x8] sm:$0xff]  ;;  %v133_v8 = vld [vmem:[#allocation3 + $0x18] sm:$0xff]  ;;  %v130_v9 = vld [vmem:[#allocation3] sm:$0xff]  ;;  %v141_v30 = vshrl.u32 %v140_v29, 7 }
  0x16   :  { %371 = vmatprep.subr.bf16.mxu0 %v370_v3  ;;  %v378_v10 = vpack.c.bf16 %v133_v8, %v131_v7  ;;  %v132_v11 = vld [vmem:[#allocation3 + $0x10] sm:$0xff]  ;;  %v36_v13 = vld [vmem:[%s548_s0 + $0x8] sm:$0xff]  ;;  %v135_v14 = vld [vmem:[#allocation3 + $0x28] sm:$0xff] }
  0x17   :  { %373 = vmatpush3.bf16.msra.mxu0 %v370_v3  ;;  %v380_v12 = vpack.c.bf16 %v132_v11, %v130_v9  ;;  %v137_v15 = vld [vmem:[#allocation3 + $0x38] sm:$0xff]  ;;  %v134_v17 = vld [vmem:[#allocation3 + $0x20] sm:$0xff]  ;;  %v136_v18 = vld [vmem:[#allocation3 + $0x30] sm:$0xff]  ;;  %v142_v31 = vsub.s32 0, %v141_v30  ;;  %v146_v33 = vsub.s32 1, %v141_v30 }
  0x18   :  { %375 = vmatprep.subr.bf16.mxu0 %v374_v6  ;;  %386 = vmatprep.subr.bf16.mxu1 %v378_v10  ;;  %v382_v16 = vpack.c.bf16 %v137_v15, %v135_v14  ;;  %v384_v19 = vpack.c.bf16 %v136_v18, %v134_v17  ;;  %v237_v20 = vld [vmem:[%s552_s4 + $0x8] sm:$0xff]  ;;  %v236_v22 = vld [vmem:[%s552_s4] sm:$0xff] }
  0x19   :  { %388 = vmatpush1.bf16.msra.mxu1 %v380_v12  ;;  %v138_v32 = vld [vmem:[%s550_s2] sm:$0x3] }
  0x1a   :  { %387 = vmatprep.subr.bf16.mxu1 %v382_v16  ;;  %v143_v34 = vrot.slane %v138_v32, %v142_v31  ;;  %v147_v35 = vrot.slane %v138_v32, %v146_v33 }
  0x1b   :  { %377 = vmatpush3.bf16.msra.mxu0 %v374_v6 }
  0x1c   :  { %379 = vmatprep.subr.bf16.mxu0 %v378_v10 }
  0x1d   :  { %389 = vmatpush1.bf16.msra.mxu1 %v384_v19 }
  0x1e   :  { %368 = vmatmul.mubr.msk.f32.vlgmr.msra.gmra.mrb[0].mxu0 %vm45_vm0, %v36_v13  ;;  %245 = vmatprep.subr.mxu1 %v237_v20 }
  0x1f   :  { %381 = vmatpush1.bf16.msra.mxu0 %v380_v12  ;;  %221 = vmatprep.mubr.f32.mxu0 %v456_v21 }
  0x20   :  { %383 = vmatprep.subr.bf16.mxu0 %v382_v16  ;;  %350 = vmatmul.mubr.msk.f32.vlgmr.msra.gmra.mrb[0].mxu1 %vm45_vm0, %v36_v13 }
  0x21   :  { %246 = vmatpush1.msra.mxu1 %v236_v22  ;;  %309 = vmatprep.mubr.f32.mxu1 %v456_v21 }
  0x23   :  { %385 = vmatpush1.bf16.msra.mxu0 %v384_v19 }
  0x26   :  { %349 = vmatmul.mubr.msk.f32.vlgmr.msra.gmra.mrb[2].mxu0 %vm45_vm0, %v35_v5 }
  0xf1   :  { %v369_v23 = vpop.f32.mrb[0].mxu0 }
  0xf2   :  { %129 = vst.msk [vmem:[#allocation2 + $0x8] sm:$0xff] %vm127_vm1, %v369_v23  ;;  %v118_v24 = vpop.f32.mrb[1].mxu0 }
  0xf3   :  { %128 = vst.msk [vmem:[#allocation2] sm:$0xff] %vm127_vm1, %v118_v24 }
  0xf9   :  { %v235_v26 = vld [vmem:[#allocation2 + $0x8] sm:$0xff]  ;;  %v223_v27 = vpop.f32.mrb[2].mxu0 }
  0xfa   :  { %v234_v25 = vld [vmem:[#allocation2] sm:$0xff]  ;;  %v225_v28 = vpop.f32.mrb[3].mxu0  ;;  %v224_v36 = vadd.f32 %v223_v27, %v143_v34 }
  0xfb   :  { %351 = vmatmul.mubr.msk.f32.vlgmr.msra.gmra.mrb[2].mxu1 %vm127_vm1, %v234_v25  ;;  %v226_v37 = vadd.f32 %v225_v28, %v147_v35 }
  0xfc   :  { %315 = vmatprep.mubr.f32.mxu1 %v456_v21 }
  0xff   :  { %352 = vmatmul.mubr.msk.f32.gmra.mrb[0].mxu1 %vm127_vm1, %v235_v26 }
 0x1ce   :  { %v311_v38 = vpop.f32.mrb[2].mxu1 }
 0x1cf   :  { %v322_v39 = vadd.f32 %v311_v38, %v224_v36  ;;  %v313_v40 = vpop.f32.mrb[3].mxu1 }
 0x1d0   :  { %v323_v41 = vadd.f32 %v313_v40, %v226_v37 }
 0x1d1   :  { %326 = vst [vmem:[#allocation6] sm:$0xff] %v322_v39 }
 0x1d2   :  { %327 = vst [vmem:[#allocation6 + $0x8] sm:$0xff] %v323_v41  ;;  %v317_v42 = vpop.f32.mrb[0].mxu1 }
 0x1d3   :  { %v394_v43 = vadd.f32 %v317_v42, %v143_v34  ;;  %v319_v44 = vpop.f32.mrb[1].mxu1 }
 0x1d4   :  { %v395_v45 = vadd.f32 %v319_v44, %v147_v35 }
 0x1d5   :  { %328 = vst [vmem:[#allocation6 + $0x10] sm:$0xff] %v394_v43 }
 0x1d6   :  { %329 = vst [vmem:[#allocation6 + $0x18] sm:$0xff] %v395_v45 }
 0x1d7   :  { %334 = vsyncadd [#allocation5], 256  ;;  %s457_s21 = smov [#allocation6]  }
 0x1d8   :  { %s335_s2 = sshll.u32 %s457_s21, 4  ;;  %s336_s2 = int_to_ptr.vmem [resolvable:$true] %s335_s2 }
 0x1d9   :  { %s427_s22 = scalar_lea.vmem %s336_s2, 256  ;;  %s431_s23 = scalar_lea.vmem %s336_s2, 512 }
 0x1da   :  { %p428_p8 = scmp.ne.s32.totalorder %s336_s2, %s427_s22  ;;  %p432_p9 = scmp.lt.s32.totalorder %s336_s2, %s336_s2 }
 0x1db   :  { %p433_p10 = scmp.lt.s32.totalorder %s431_s23, %s427_s22 }
 0x1dd   :  { %p434_p11 = por %p433_p10, %p432_p9 }
 0x1df   :  { %p435_p12 = pnand %p434_p11, %p428_p8 }
 0x1e1   :  { %438 = shalt.err (!%p435_p12)
}
 0x1e2   :  { %s439_s26 = scalar_lea.hbm %s553_s5, 256 }
 0x1e3   :  { %p440_p13 = scmp.ne.s32.totalorder %s553_s5, %s439_s26  ;;  %p443_p0 = scmp.lt.u32.totalorder %s439_s26, %s553_s5 }
 0x1e5   :  { %p445_p1 = pnand %p443_p0, %p440_p13 }
 0x1e7   :  { %448 = shalt.err (!%p445_p1)
}
 0x1e8   :  { %s458_s7 = smov 128   ;;  %s459_s8 = smov 8  }
 0x1e9   :  { %341 = dma.vmem_to_hbm [thread:$0]  %s336_s2, 256, %s553_s5, [#allocation5], %s454_s28, %s458_s7, %s459_s8  }
 0x1ea   :  { %451 = dma.done.wait [#allocation5], 512  }
 0x1eb   :  { %452 = vsyncadd [#allocation5], 4294966784 }
 0x1ec   :  { %345 = vsyncpa [#allocation4], 1 }
 0x1ed   :  { %346 = vsyncpa [#allocation5], 1 }

</bundles_post_ra>
